<compile_context>
chip_gen: v6e
topology: v6e:2x2x1
jax: 0.10.0
libtpu: 0.0.40
codegen_flags: <defaults>
</compile_context>

<pallas_src>
import functools

import jax
import jax.numpy as jnp
from jax.experimental import pallas as pl
from jax.experimental.pallas import tpu as pltpu


def _fc_head_kernel(feat_ref, w_ref, b_ref, out_ref, *, activate, multiclass):
    feat = feat_ref[...].astype(jnp.float32)          # (TN, F)
    w = w_ref[...].astype(jnp.float32)                # (F, Cpad)
    b = b_ref[...].astype(jnp.float32)                # (1, Cpad)

    # x = fc(features)
    logits = jnp.dot(feat, w, preferred_element_type=jnp.float32) + b

    if activate:
        if multiclass:
            # softmax(x, dim=-1), numerically stable, EUP reciprocal.
            m = jnp.max(logits, axis=-1, keepdims=True)
            e = jnp.exp(logits - m)
            inv = pl.reciprocal(jnp.sum(e, axis=-1, keepdims=True), approx=True)
            out = e * inv
        else:
            # sigmoid(x)
            out = 1.0 / (1.0 + jnp.exp(-logits))
    else:
        out = logits

    out_ref[...] = out.astype(out_ref.dtype)


def compare_model_head(features, fc_weight, fc_bias, *, activate=False,
                       with_features=False, batch_tile=8):
    """CompareModel head: fc + optional softmax/sigmoid.

    features : (N, F) backbone output (pool = Identity for default bases)
    fc_weight: (C, F) torch Linear layout, fc_bias: (C,)
    """
    N, F = features.shape
    C, Fw = fc_weight.shape
    assert Fw == F
    multiclass = C > 1

    # Lane-dense padding of the class dim (multiple of 128).  Padded classes
    # have weight 0 and a very negative bias so exp(.) == 0 in the softmax
    # denominator; they are sliced off afterwards.
    c_pad = pl.cdiv(C, 128) * 128
    w_t = jnp.zeros((F, c_pad), jnp.float32).at[:, :C].set(
        fc_weight.T.astype(jnp.float32))
    b_p = jnp.full((1, c_pad), -1e30, jnp.float32).at[0, :C].set(
        fc_bias.astype(jnp.float32))

    # Pad batch to a multiple of the (>= 8 sublane) batch tile.
    tn = max(8, min(batch_tile, N))
    n_pad = pl.cdiv(N, tn) * tn
    feat_p = jnp.zeros((n_pad, F), features.dtype).at[:N].set(features)

    kernel = functools.partial(_fc_head_kernel, activate=activate,
                               multiclass=multiclass)

    out = pl.pallas_call(
        kernel,
        out_shape=jax.ShapeDtypeStruct((n_pad, c_pad), jnp.float32),
        grid=(n_pad // tn,),
        in_specs=[
            pl.BlockSpec((tn, F), lambda i: (i, 0)),      # batch-tiled features
            pl.BlockSpec((F, c_pad), lambda i: (0, 0)),   # VMEM-resident weight
            pl.BlockSpec((1, c_pad), lambda i: (0, 0)),   # VMEM-resident bias
        ],
        out_specs=pl.BlockSpec((tn, c_pad), lambda i: (i, 0)),
        compiler_params=pltpu.CompilerParams(
            dimension_semantics=("parallel",)),
    )(feat_p, w_t, b_p)

    x = out[:N, :C]
    if with_features:
        return x, features
    return x


if __name__ == "__main__":
    key = jax.random.PRNGKey(0)
    batch, num_features, num_classes = 16, 256, 8

    k1, k2, k3 = jax.random.split(key, 3)
    # TODO(synk): `self.base` is a pretrained timm backbone (external weights /
    # network download); stand-in features are drawn directly at (N, F).
    features = jax.random.normal(k1, (batch, num_features), dtype=jnp.float32)
    fc_w = 0.02 * jax.random.normal(k2, (num_classes, num_features),
                                    dtype=jnp.float32)
    fc_b = 0.02 * jax.random.normal(k3, (num_classes,), dtype=jnp.float32)

    probs = compare_model_head(features, fc_w, fc_b, activate=True)     # softmax path
    logits = compare_model_head(features, fc_w, fc_b, activate=False)   # raw fc path
    jax.block_until_ready((probs, logits))
    print("KERNEL_OK")
</pallas_src>

<mosaic_0001>
module attributes {stable_mosaic.version = 11 : i64} {
  func.func @_fc_head_kernel(%arg0: i32, %arg1: memref<8x256xf32, #tpu.memory_space<vmem>>, %arg2: memref<256x128xf32, #tpu.memory_space<vmem>>, %arg3: memref<1x128xf32, #tpu.memory_space<vmem>>, %arg4: memref<8x128xf32, #tpu.memory_space<vmem>>) attributes {dimension_semantics = [#tpu.dimension_semantics<parallel>], iteration_bounds = array<i64: 2>, scalar_prefetch = 0 : i64, scratch_operands = 0 : i64, tpu.core_type = #tpu.core_type<tc>, window_params = [{transform_indices = @transform_0, window_bounds = array<i64: 8, 256>}, {pipeline_mode = #tpu.pipeline_mode<synchronous>, transform_indices = @transform_1, window_bounds = array<i64: 256, 128>}, {pipeline_mode = #tpu.pipeline_mode<synchronous>, transform_indices = @transform_2, window_bounds = array<i64: 1, 128>}, {transform_indices = @transform_3, window_bounds = array<i64: 8, 128>}]} {
    %c0 = arith.constant 0 : index
    %c0_0 = arith.constant 0 : index
    %0 = vector.load %arg1[%c0, %c0_0] : memref<8x256xf32, #tpu.memory_space<vmem>>, vector<8x256xf32>
    %c0_1 = arith.constant 0 : index
    %c0_2 = arith.constant 0 : index
    %1 = vector.load %arg2[%c0_1, %c0_2] : memref<256x128xf32, #tpu.memory_space<vmem>>, vector<256x128xf32>
    %c0_3 = arith.constant 0 : index
    %c0_4 = arith.constant 0 : index
    %2 = vector.load %arg3[%c0_3, %c0_4] : memref<1x128xf32, #tpu.memory_space<vmem>>, vector<1x128xf32>
    %cst = arith.constant dense<0.000000e+00> : vector<8x128xf32>
    %3 = tpu.matmul %0, %1, %cst {dimension_numbers = #tpu.dot_dimension_numbers<[1], [0], [0], [1], [0, 0, 1, 1], [], []>} : vector<8x256xf32>, vector<256x128xf32>, vector<8x128xf32> -> vector<8x128xf32>
    %4 = vector.broadcast %2 : vector<1x128xf32> to vector<8x128xf32>
    %5 = arith.addf %3, %4 : vector<8x128xf32>
    %cst_5 = arith.constant dense<0xFF800000> : vector<8xf32>
    %6 = vector.multi_reduction <maximumf>, %5, %cst_5 [1] : vector<8x128xf32> to vector<8xf32>
    %7 = vector.shape_cast %6 : vector<8xf32> to vector<8x1xf32>
    %8 = vector.broadcast %7 : vector<8x1xf32> to vector<8x128xf32>
    %9 = arith.subf %5, %8 : vector<8x128xf32>
    %10 = math.exp %9 : vector<8x128xf32>
    %cst_6 = arith.constant dense<0.000000e+00> : vector<8xf32>
    %11 = vector.multi_reduction <add>, %10, %cst_6 [1] : vector<8x128xf32> to vector<8xf32>
    %12 = vector.shape_cast %11 : vector<8xf32> to vector<8x1xf32>
    %13 = tpu.reciprocal %12 {approx = true} : vector<8x1xf32> -> vector<8x1xf32>
    %14 = vector.broadcast %13 : vector<8x1xf32> to vector<8x128xf32>
    %15 = arith.mulf %10, %14 : vector<8x128xf32>
    %c0_7 = arith.constant 0 : index
    %c0_8 = arith.constant 0 : index
    %16 = vector.load %arg4[%c0_7, %c0_8] : memref<8x128xf32, #tpu.memory_space<vmem>>, vector<8x128xf32>
    tpu.vector_store %arg4[%c0_7, %c0_8], %15 {strides = array<i32>} : memref<8x128xf32, #tpu.memory_space<vmem>>, vector<8x128xf32>,
    return
  }
  func.func @transform_0(%arg0: i32) -> (i32, i32) {
    %c0_i32 = arith.constant 0 : i32
    %c0_i32_0 = arith.constant 0 : i32
    return %arg0, %c0_i32 : i32, i32
  }
  func.func @transform_1(%arg0: i32) -> (i32, i32) {
    %c0_i32 = arith.constant 0 : i32
    %c0_i32_0 = arith.constant 0 : i32
    %c0_i32_1 = arith.constant 0 : i32
    return %c0_i32, %c0_i32_0 : i32, i32
  }
  func.func @transform_2(%arg0: i32) -> (i32, i32) {
    %c0_i32 = arith.constant 0 : i32
    %c0_i32_0 = arith.constant 0 : i32
    %c0_i32_1 = arith.constant 0 : i32
    return %c0_i32, %c0_i32_0 : i32, i32
  }
  func.func @transform_3(%arg0: i32) -> (i32, i32) {
    %c0_i32 = arith.constant 0 : i32
    %c0_i32_0 = arith.constant 0 : i32
    return %arg0, %c0_i32 : i32, i32
  }
}

</mosaic_0001>

<bundles_post_ra>
// kernel: tpu_custom_call.1
= control target key start
LH: loop header
LB: loop body
LE: loop exit
PB: predicated region body
PF: predicated region fallthrough
CT: control target
= control target key end

     0   :  { %8 = vsyncpa [#allocation3], 0  ;;  %s843_s0 = inlined_call_operand.hbm [shape: f32[16,256], index: 0, kind: input, shape index: {}]   ;;  %s844_s1 = inlined_call_operand.hbm [shape: f32[256,128], index: 1, kind: input, shape index: {}]   ;;  %s845_s2 = inlined_call_operand.vmem [shape: f32[1,128], index: 2, kind: input, shape index: {}]   ;;  %s846_s3 = inlined_call_operand.hbm [shape: f32[16,128], index: 3, kind: output, shape index: {}]  }
   0x1   :  { %10 = vsyncpa [#allocation3 + $0x1], 0 }
   0x2   :  { %11 = vsyncpa [#allocation6], 0 }
   0x3   :  { %12 = vsyncpa [#allocation4], 0 }
   0x4   :  { %14 = vsyncpa [#allocation4 + $0x1], 0  ;;  %s681_s12 = smov 0   ;;  %s683_s13 = smov 0  }
   0x5   :  { %s685_s14 = smov 0   ;;  %s687_s15 = smov 0  }
   0x6 LB: > { %s702_s16 = sadd.s32 4294967295, %s654_s15   ;;  %s417_s17 = sadd.s32 4294967294, %s654_s15   ;;  %s654_s15 = sphi %s687_s15, %s868_s15   ;;  %s650_s14 = sphi %s685_s14, %s867_s14   ;;  %s646_s13 = sphi %s683_s13, %s866_s13   ;;  %s642_s12 = sphi %s681_s12, %s865_s12  }
   0x7   : > { %p40_p0 = scmp.ne.s32.totalorder %s646_s13, %s642_s12  ;;  %p847_p1 = scmp.eq.s32.totalorder %s702_s16, 0 }
   0x8   : > { %p112_p3 = scmp.eq.s32.totalorder %s417_s17, 1  ;;  %p418_p5 = scmp.ge.s32.totalorder %s654_s15, 1 }
   0x9   : > { %p711_p4 = por %p847_p1, %p40_p0  ;;  %p119_p7 = scmp.lt.s32.totalorder %s654_s15, 3 }
   0xa   : > { %p716_p6 = por %p112_p3, %p40_p0  ;;  %s656_s21 = smov [#allocation5]  }
   0xb   : > { %s851_s18 = scalar_select %p711_p4, 1, 0 }
   0xc   : > { %s852_s19 = scalar_select %p716_p6, 1, 0 }
   0xd   : > { %p721_p8 = pnand %p418_p5, %p119_p7  ;;  %s131_s22 = sshll.u32 %s656_s21, 4  ;;  %s132_s22 = int_to_ptr.vmem [resolvable:$true] %s131_s22 }
   0xe   : > { %s735_s24 = sadd.s32 1, %s654_s15   ;;  %s27_s25 = sadd.s32 1, %s650_s14 }
   0xf   : > { %s853_s20 = scalar_select %p721_p8, 1, 0 }
  0x10   : > { %p477_p9 = pneg %p721_p8  ;;  %s24_s26 = ssub.s32 %s654_s15, %s735_s24 }
  0x11   : > { %s543_s27 = scalar_lea.vmem %s132_s22, 4096  ;;  %p551_p5 = scmp.lt.s32.totalorder %s132_s22, %s132_s22 }
  0x12   : > { %p730_p11 = pnand %p477_p9, %p847_p1  ;;  %p544_p13 = scmp.ne.s32.totalorder %s132_s22, %s543_s27 }
  0x13   : > { %p552_p7 = scmp.lt.s32.totalorder %s543_s27, %s543_s27 }
  0x14   : > { %p534_p12 = pneg %p730_p11 }
  0x15   : > { %p553_p10 = por %p552_p7, %p551_p5 }
  0x16   : > { %p546_p0 = pnand %p544_p13, %p534_p12 }
  0x18   : > { %p547_p3 = pneg %p546_p0 }
  0x1a   : > { %p554_p2 = pnand %p553_p10, %p547_p3 }
  0x1c   : > { %557 = shalt.err (!%p554_p2)
}
  0x1d   : > { %s657_s28 = smov 128   ;;  %s658_s29 = smov 8  }
  0x1e   : > { %480 = dma.hbm_to_vmem [thread:$0]  (!%p730_p11), %s844_s1, 4096, %s132_s22, [#allocation6], %s657_s28, %s657_s28, %s658_s29  }
  0x1f   : > { %p25_p9 = scmp.eq.s32.totalorder %s24_s26, 0  ;;  %p34_p12 = scmp.ne.s32.totalorder %s650_s14, %s646_s13 }
  0x20   : > { %p35_p10 = scmp.eq.s32.totalorder %s654_s15, 0  ;;  %p490_p2 = scmp.lt.s32.totalorder %s654_s15, 2 }
  0x21   : > { %s752_s5 = scalar_select %p25_p9, %s650_s14, %s27_s25  }
  0x22   : > { %p36_p13 = por %p35_p10, %p34_p12  ;;  %p855_p0 = scmp.eq.s32.totalorder %s702_s16, 1 }
  0x23   : > { %s148_s7 = sand.u32 1, %s650_s14   ;;  %s433_s8 = sshll.u32 %s654_s15, 8 }
  0x24   : > { %p756_p3 = por %p855_p0, %p34_p12  ;;  %s421_s9 = sshll.u32 %s148_s7, 4 }
  0x25   : > { %s765_s17 = scalar_lea.hbm %s843_s0, %s433_s8  ;;  %s152_s21 = scalar_lea.vmem [#allocation2], %s421_s9 }
  0x26   : > { %s856_s6 = scalar_select %p756_p3, 1, 0 }
  0x27   : > { %s160_s22 = sshll.u32 %s152_s21, 4  ;;  %p767_p11 = pnand %p490_p2, %p36_p13  ;;  %s161_s22 = int_to_ptr.vmem [resolvable:$true] %s160_s22 }
  0x28   : > { %s149_s25 = scalar_lea.sflag [#allocation3], %s148_s7  ;;  %s558_s26 = scalar_lea.hbm %s765_s17, 256 }
  0x29   : > { %p559_p5 = scmp.ne.s32.totalorder %s765_s17, %s558_s26  ;;  %p560_p7 = pneg %p767_p11 }
  0x2a   : > { %s563_s29 = scalar_lea.hbm %s843_s0, 512  ;;  %p564_p10 = scmp.lt.s32.totalorder %s765_s17, %s843_s0 }
  0x2b   : > { %p561_p9 = pnand %p560_p7, %p559_p5  ;;  %p565_p2 = scmp.lt.s32.totalorder %s563_s29, %s558_s26 }
  0x2d   : > { %p562_p12 = pneg %p561_p9  ;;  %p566_p13 = por %p565_p2, %p564_p10 }
  0x2f   : > { %p567_p0 = pnand %p566_p13, %p562_p12 }
  0x31   : > { %570 = shalt.err (!%p567_p0)
}
  0x32   : > { %s571_s8 = scalar_lea.vmem %s161_s22, 256  ;;  %s659_s7 = smov [#allocation2]  }
  0x33   : > { %p572_p1 = scmp.ne.s32.totalorder %s161_s22, %s571_s8  ;;  %s576_s9 = sshll.u32 %s659_s7, 4  ;;  %s577_s9 = int_to_ptr.vmem [resolvable:$false] %s576_s9 }
  0x34   : > { %s578_s10 = scalar_lea.vmem %s577_s9, 512  ;;  %p579_p5 = scmp.lt.s32.totalorder %s161_s22, %s577_s9 }
  0x35   : > { %p574_p6 = pnand %p572_p1, %p560_p7  ;;  %p580_p9 = scmp.lt.s32.totalorder %s578_s10, %s571_s8 }
  0x37   : > { %p575_p3 = pneg %p574_p6  ;;  %p581_p4 = por %p580_p9, %p579_p5 }
  0x39   : > { %p582_p8 = pnand %p581_p4, %p575_p3 }
  0x3b   : > { %585 = shalt.err (!%p582_p8)
}
  0x3c   : > { %484 = dma.hbm_to_vmem [thread:$0]  (!%p767_p11), %s765_s17, 256, %s161_s22, %s149_s25  }
  0x3d   : > { %p858_p12 = scmp.ne.s32.totalorder %s853_s20, 0 }
  0x3e   : > { %s788_s11 = sand.u32 (!%p858_p12), 1, %s646_s13   ;;  %p859_p1 = scmp.ne.s32.totalorder (!%p858_p12), %s851_s18, 0 }
  0x3f   : > { %169 = sbr.rel (%p858_p12) target bundleno = 627 (0x273), region = 32  ;;  %s425_s21 = sshll.u32 (!%p858_p12), %s788_s11, 4 }
  0x40   : > { %s172_s26 = scalar_lea.sflag (!%p858_p12), [#allocation3], %s788_s11  ;;  %s792_s27 = scalar_lea.vmem (!%p858_p12), [#allocation2], %s425_s21 }
  0x44   : > { %629 = dma.done.wait (%p859_p1), %s172_s26, 256  }
  0x45   : > { %631 = vsyncadd (%p859_p1), %s172_s26, 4294967040  ;;  %p860_p4 = scmp.eq.s32.totalorder %s702_s16, 0 }
  0x47   : > { %633 = dma.done.wait (%p860_p4), [#allocation6], 4096   ;;  %p861_p6 = pmov %p860_p4 }
  0x48   : > { %v235_v0 = vld [vmem:[#allocation5 + $0xf8] sm:$0xff]  ;;  %v234_v2 = vld [vmem:[#allocation5 + $0xf0] sm:$0xff]  ;;  %v233_v4 = vld [vmem:[#allocation5 + $0xe8] sm:$0xff]  ;;  %s427_s17 = sshll.u32 %s788_s11, 3  ;;  %s430_s22 = sshll.u32 %s702_s16, 7 }
  0x49   : > { %635 = vsyncadd (%p861_p6), [#allocation6], 4294963200  ;;  %v219_v1 = vld [vmem:[#allocation5 + $0x78] sm:$0xff]  ;;  %434 = vmatprep.subr.mxu0 %v235_v0  ;;  %v218_v3 = vld [vmem:[#allocation5 + $0x70] sm:$0xff]  ;;  %s201_s23 = scalar_lea.vmem [#allocation7], %s427_s17  ;;  %s335_s30 = scalar_lea.hbm %s846_s3, %s430_s22 }
  0x4a   : > { %435 = vmatpush3.msra.mxu0 %v219_v1  ;;  %v217_v5 = vld [vmem:[#allocation5 + $0x68] sm:$0xff]  ;;  %v232_v6 = vld [vmem:[#allocation5 + $0xe0] sm:$0xff]  ;;  %v231_v8 = vld [vmem:[#allocation5 + $0xd8] sm:$0xff]  ;;  %s337_s25 = sshll.u32 %s201_s23, 4  ;;  %s324_s4 = scalar_lea.sflag [#allocation4], %s788_s11  ;;  %s338_s25 = int_to_ptr.vmem [resolvable:$true] %s337_s25 }
  0x4b   : > { %436 = vmatprep.subr.mxu0 %v234_v2  ;;  %v216_v7 = vld [vmem:[#allocation5 + $0x60] sm:$0xff]  ;;  %v215_v9 = vld [vmem:[#allocation5 + $0x58] sm:$0xff]  ;;  %v230_v10 = vld [vmem:[#allocation5 + $0xd0] sm:$0xff]  ;;  %s586_s8 = scalar_lea.vmem %s338_s25, 128  ;;  %p862_p3 = scmp.ne.s32.totalorder %s856_s6, 0 }
  0x4c   : > { %437 = vmatpush3.msra.mxu0 %v218_v3  ;;  %v214_v11 = vld [vmem:[#allocation5 + $0x50] sm:$0xff]  ;;  %v229_v12 = vld [vmem:[#allocation5 + $0xc8] sm:$0xff]  ;;  %v228_v15 = vld [vmem:[#allocation5 + $0xc0] sm:$0xff]  ;;  %p587_p8 = scmp.ne.s32.totalorder %s338_s25, %s586_s8  ;;  %s660_s7 = smov [#allocation7]  }
  0x4d   : > { %438 = vmatprep.subr.mxu0 %v233_v4  ;;  %v203_v13 = vld [vmem:[%s792_s27 + $0x8] sm:$0xff]  ;;  %v212_v16 = vld [vmem:[#allocation5 + $0x40] sm:$0xff]  ;;  %v226_v19 = vld [vmem:[#allocation5 + $0xb0] sm:$0xff]  ;;  %s590_s9 = sshll.u32 %s660_s7, 4  ;;  %s591_s9 = int_to_ptr.vmem [resolvable:$false] %s590_s9 }
  0x4e   : > { %439 = vmatpush3.msra.mxu0 %v217_v5  ;;  %v213_v14 = vld [vmem:[#allocation5 + $0x48] sm:$0xff]  ;;  %307 = vmatprep.mubr.f32.mxu0 %v203_v13  ;;  %v227_v17 = vld [vmem:[#allocation5 + $0xb8] sm:$0xff]  ;;  %v210_v20 = vld [vmem:[#allocation5 + $0x30] sm:$0xff]  ;;  %p588_p11 = pnand %p587_p8, %p862_p3  ;;  %s592_s16 = scalar_lea.vmem %s591_s9, 256 }
  0x4f   : > { %440 = vmatprep.subr.mxu0 %v232_v6  ;;  %v211_v18 = vld [vmem:[#allocation5 + $0x38] sm:$0xff]  ;;  %v225_v21 = vld [vmem:[#allocation5 + $0xa8] sm:$0xff]  ;;  %v224_v23 = vld [vmem:[#allocation5 + $0xa0] sm:$0xff]  ;;  %p593_p10 = scmp.lt.s32.totalorder %s338_s25, %s591_s9  ;;  %p594_p2 = scmp.lt.s32.totalorder %s592_s16, %s586_s8 }
  0x50   : > { %441 = vmatpush3.msra.mxu0 %v216_v7  ;;  %v209_v22 = vld [vmem:[#allocation5 + $0x28] sm:$0xff]  ;;  %v208_v24 = vld [vmem:[#allocation5 + $0x20] sm:$0xff]  ;;  %v223_v25 = vld [vmem:[#allocation5 + $0x98] sm:$0xff]  ;;  %p589_p7 = pneg %p588_p11 }
  0x51   : > { %442 = vmatprep.subr.mxu0 %v231_v8  ;;  %v207_v26 = vld [vmem:[#allocation5 + $0x18] sm:$0xff]  ;;  %v222_v27 = vld [vmem:[#allocation5 + $0x90] sm:$0xff]  ;;  %v221_v29 = vld [vmem:[#allocation5 + $0x88] sm:$0xff]  ;;  %p595_p13 = por %p594_p2, %p593_p10 }
  0x52   : > { %443 = vmatpush3.msra.mxu0 %v215_v9  ;;  %v206_v28 = vld [vmem:[#allocation5 + $0x10] sm:$0xff]  ;;  %v205_v30 = vld [vmem:[#allocation5 + $0x8] sm:$0xff]  ;;  %v220_v31 = vld [vmem:[#allocation5 + $0x80] sm:$0xff] }
  0x53   : > { %444 = vmatprep.subr.mxu0 %v230_v10  ;;  %v204_v32 = vld [vmem:[#allocation5] sm:$0xff]  ;;  %p596_p0 = pnand %p595_p13, %p589_p7 }
  0x54   : > { %445 = vmatpush3.msra.mxu0 %v214_v11  ;;  %v202_v33 = vld [vmem:[%s792_s27] sm:$0xff] }
  0x55   : > { %446 = vmatprep.subr.mxu0 %v229_v12  ;;  %v428_v36 = vld [vmem:[%s845_s2] ss:$0 sm:$0xff] }
  0x56   : > { %447 = vmatpush3.msra.mxu0 %v213_v14 }
  0x57   : > { %448 = vmatprep.subr.mxu0 %v228_v15 }
  0x58   : > { %449 = vmatpush3.msra.mxu0 %v212_v16 }
  0x59   : > { %450 = vmatprep.subr.mxu0 %v227_v17 }
  0x5a   : > { %451 = vmatpush3.msra.mxu0 %v211_v18 }
  0x5b   : > { %452 = vmatprep.subr.mxu0 %v226_v19 }
  0x5c   : > { %453 = vmatpush3.msra.mxu0 %v210_v20 }
  0x5d   : > { %454 = vmatprep.subr.mxu0 %v225_v21 }
  0x5e   : > { %455 = vmatpush3.msra.mxu0 %v209_v22 }
  0x5f   : > { %456 = vmatprep.subr.mxu0 %v224_v23 }
  0x60   : > { %457 = vmatpush3.msra.mxu0 %v208_v24 }
  0x61   : > { %458 = vmatprep.subr.mxu0 %v223_v25 }
  0x62   : > { %459 = vmatpush3.msra.mxu0 %v207_v26 }
  0x63   : > { %460 = vmatprep.subr.mxu0 %v222_v27 }
  0x64   : > { %461 = vmatpush3.msra.mxu0 %v206_v28 }
  0x65   : > { %462 = vmatprep.subr.mxu0 %v221_v29 }
  0x66   : > { %463 = vmatpush3.msra.mxu0 %v205_v30 }
  0x67   : > { %464 = vmatprep.subr.mxu0 %v220_v31 }
  0x68   : > { %465 = vmatpush3.msra.mxu0 %v204_v32 }
  0x69   : > { %308 = vmatmul.mubr.f32.vlgmr.msra.gmra.mxu0 %v202_v33 }
 0x129   : > { %v466_v34 = vpop.f32.mrf.mxu0 }
 0x12b   : > { %v467_v35 = vpop.f32.mrf.mxu0 }
 0x12c   : > { %v468_v37 = vadd.f32 %v467_v35, %v466_v34 }
 0x12e   : > { %v310_v38 = vadd.f32 %v468_v37, %v428_v36 }
 0x130   : > { %313 = vmax.xlane.f32.xlu0 %v310_v38 }
 0x1b9   : > { %v314_v39 = vpop.xlane.xlu0 %313 }
 0x1ba   : > { %v315_v40 = vsub.f32 %v310_v38, %v314_v39 }
 0x1bc   : > { %v316_v41 = vmul.f32 1.442695, %v315_v40 }
 0x1be   : > { %528 = vpow2.f32 %v316_v41 }
 0x1cb   : > { %v529_v42 = vpop.eup %528 }
 0x1cc   : > { %318 = vadd.xlane.f32.xlu0 %v529_v42 }
 0x255   : > { %v319_v43 = vpop.xlane.xlu0 %318 }
 0x256   : > { %530 = vrcp.f32 %v319_v43 }
 0x263   : > { %v531_v44 = vpop.eup %530 }
 0x264   : > { %v321_v45 = vmul.f32 %v531_v44, %v529_v42 }
 0x266   : > { %322 = vst [vmem:[%s201_s23] sm:$0xff] %v321_v45 }
 0x267   : > { %599 = shalt.err (!%p596_p0)
}
 0x268   : > { %s600_s10 = scalar_lea.hbm %s335_s30, 128  ;;  %s604_s26 = scalar_lea.hbm %s846_s3, 256 }
 0x269   : > { %p601_p5 = scmp.ne.s32.totalorder %s335_s30, %s600_s10  ;;  %p605_p1 = scmp.lt.s32.totalorder %s335_s30, %s846_s3 }
 0x26a   : > { %p606_p4 = scmp.lt.s32.totalorder %s604_s26, %s600_s10 }
 0x26b   : > { %p602_p9 = pnand %p601_p5, %p862_p3 }
 0x26c   : > { %p607_p6 = por %p606_p4, %p605_p1 }
 0x26d   : > { %p603_p12 = pneg %p602_p9 }
 0x26f   : > { %p608_p8 = pnand %p607_p6, %p603_p12 }
 0x271   : > { %611 = shalt.err (!%p608_p8)
}
 0x272   : > { %475 = dma.vmem_to_hbm [thread:$0]  (%p862_p3), %s338_s25, 128, %s335_s30, %s324_s4  }
 0x273 PF: > { %s349_s20 = sand.u32 1, %s642_s12   ;;  %p863_p11 = scmp.ne.s32.totalorder %s852_s19, 0 }
 0x274   : > { %p864_p7 = scmp.ge.s32.totalorder %s654_s15, 2  ;;  %s350_s17 = scalar_lea.sflag [#allocation4], %s349_s20 }
 0x276   : > { %p486_p10 = pnand %p864_p7, %p863_p11 }
 0x278   : > { %p487_p2 = pneg %p486_p10 }
 0x27a   : > { %637 = dma.done.wait (%p487_p2), %s350_s17, 128  }
 0x27b   : > { %639 = vsyncadd (%p487_p2), %s350_s17, 4294967168  ;;  %p17_p13 = scmp.ge.s32.totalorder %s735_s24, 4   ;;  %s865_s12 = smov %s646_s13 }
 0x27c   : > { %s866_s13 = smov %s650_s14  ;;  %s867_s14 = smov %s752_s5 }
 0x27d   : > { %s868_s15 = smov %s735_s24  ;;  %19 = sbr.rel (!%p17_p13) target bundleno = 6 (0x6), region = 81 }
 0x282   :  { %355 = vsyncpa [#allocation3], 1 }
 0x283   :  { %357 = vsyncpa [#allocation3 + $0x1], 1 }
 0x284   :  { %358 = vsyncpa [#allocation6], 1 }
 0x285   :  { %359 = vsyncpa [#allocation4], 1 }
 0x286   :  { %361 = vsyncpa [#allocation4 + $0x1], 1 }

</bundles_post_ra>
